<compile_context>
chip_gen: v7x
topology: tpu7x:2x2x1
jax: 0.10.0
libtpu: 0.0.40
codegen_flags: <defaults>
</compile_context>

<pallas_src>
import functools

import jax
import jax.numpy as jnp
from jax.experimental import pallas as pl
from jax.experimental.pallas import tpu as pltpu


def _round_up(v, m):
    return (v + m - 1) // m * m


def _vmem_spec():
    return pl.BlockSpec(memory_space=pltpu.MemorySpace.VMEM)


def _padded_bytes(shape, dtype):
    """(8,128)-padded VMEM footprint of a full-array operand (budget estimate)."""
    shape = tuple(shape)
    if len(shape) == 1:
        shape = (1,) + shape
    r = _round_up(shape[-2], 8)
    c = _round_up(shape[-1], 128)
    return r * c * jnp.dtype(dtype).itemsize


# --------------------------------------------------------------------------
# Fused Pallas kernel:
#   block-diagonal Chebyshev recursion (3 graphs at once, f32)
#   -> 3 stacked-weight dots + folded-BN bias + ReLU on aligned row slices
#   -> reassociated knn interpolation + conv_mix (K=1) + bias
# --------------------------------------------------------------------------
def _make_fused_kernel(K, NP, C1P, NT, KF, HP):
    f32 = jnp.float32

    def kernel(lap_ref, x_ref, a1_ref, a2_ref, w_ref, b_ref, wm_ref, bm_ref,
               o_ref):
        cdt = w_ref.dtype                       # bf16 fast path / f32 check path
        lap = lap_ref[...]                      # [NT, NT]  f32 block-diagonal
        x = x_ref[...]                          # [NT, fin] f32 stacked features

        # ---- Chebyshev recursion, once for all three graphs (f32) ----------
        t_prev = x
        ts = [t_prev]
        if K > 1:
            t_cur = jnp.dot(lap, x, preferred_element_type=f32)
            ts.append(t_cur)
            for _ in range(2, K):
                t_next = (2.0 * jnp.dot(lap, t_cur, preferred_element_type=f32)
                          - t_prev)
                ts.append(t_next)
                t_prev, t_cur = t_cur, t_next
        # fin-wide chunks -> contraction = K*fin (144), not K*128 (768)
        t_stack = jnp.concatenate(ts, axis=1)   # [NT, K*fin] f32

        # ---- per-graph stacked-weight ChebConv + folded-BN bias + ReLU -----
        def head(g, r0, r1):
            t = t_stack[r0:r1].astype(cdt)                  # 8-aligned row slice
            w = w_ref[g * KF:(g + 1) * KF, :]               # [K*fin, HP]
            h = jnp.dot(t, w, preferred_element_type=f32) + b_ref[g:g + 1, :]
            return jnp.maximum(h, 0.0)

        h1 = head(0, 0, NP)                     # fine graph      [NP,  HP]
        h2 = head(1, NP, NP + C1P)              # pooled graph 1  [C1P, HP]
        h3 = head(2, NP + C1P, NT)              # pooled graph 2  [C2P, HP]

        # ---- reassociated interpolation + mix:  A @ (H @ Wm), not (A@H) @ Wm
        # (padded-cluster rows of h2/h3 are relu(bias) != 0, but the matching
        #  columns of a1/a2 are zero, so they contribute nothing.)
        z1 = jnp.dot(h2.astype(cdt), wm_ref[1 * HP:2 * HP, :],
                     preferred_element_type=f32)            # [C1P, FOUTP]
        z2 = jnp.dot(h3.astype(cdt), wm_ref[2 * HP:3 * HP, :],
                     preferred_element_type=f32)            # [C2P, FOUTP]
        y = (jnp.dot(h1.astype(cdt), wm_ref[0 * HP:1 * HP, :],
                     preferred_element_type=f32)
             + jnp.dot(a1_ref[...], z1, preferred_element_type=f32)
             + jnp.dot(a2_ref[...], z2, preferred_element_type=f32)
             + bm_ref[...])
        o_ref[...] = y.astype(o_ref.dtype)      # lane-dense [NP, FOUTP] slab

    return kernel


def _forward_from_prep(x, arrays, *, N, C1, C2, fin, fout, K, NP, C1P, C2P,
                       NT, KF, HP, FOUTP, vmem_bytes):
    """Per-forward path: feature max-pool, x_all assembly, one pallas_call."""
    f32 = jnp.float32

    def pool_feats(cluster, counts, n_clusters):
        xt = jax.ops.segment_max(x, cluster, num_segments=n_clusters)
        return jnp.where(counts[:, None] > 0, xt, 0.0)      # empty-cluster guard

    x_t1 = pool_feats(arrays["cluster1"], arrays["counts1"], C1)
    x_t2 = pool_feats(arrays["cluster2"], arrays["counts2"], C2)

    x_all = jnp.zeros((NT, fin), f32)
    x_all = x_all.at[:N].set(x.astype(f32))
    x_all = x_all.at[NP:NP + C1].set(x_t1)
    x_all = x_all.at[NP + C1P:NP + C1P + C2].set(x_t2)

    args = (arrays["lap_all"], x_all, arrays["a1"], arrays["a2"],
            arrays["w_all"], arrays["b_all"], arrays["wm_all"], arrays["bm"])

    y_pad = pl.pallas_call(
        _make_fused_kernel(K, NP, C1P, NT, KF, HP),
        out_shape=jax.ShapeDtypeStruct((NP, FOUTP), jnp.float32),
        in_specs=[_vmem_spec() for _ in args],
        out_specs=_vmem_spec(),
        compiler_params=pltpu.CompilerParams(vmem_limit_bytes=vmem_bytes),
    )(*args)
    # dropout (p=0.5) is identity in eval mode
    return y_pad[:N, :fout]


# --------------------------------------------------------------------------
# JAX glue: graph structure, pooling, knn weight matrices
# --------------------------------------------------------------------------
def dense_adj(edge_index, n):
    a = jnp.zeros((n, n), jnp.float32)
    return a.at[edge_index[0], edge_index[1]].set(1.0)


def scaled_laplacian(adj):
    # ChebConv(normalization='sym', lambda_max=2) => L_hat = -D^{-1/2} A D^{-1/2}
    deg = adj.sum(axis=1)
    dinv = jnp.where(deg > 0, jax.lax.rsqrt(jnp.maximum(deg, 1e-30)), 0.0)
    return -(dinv[:, None] * adj * dinv[None, :])


def pool_structure(cluster, pos, adj, batch_cat, n_clusters):
    """Structure half of torch_geometric.nn.max_pool: mean-pool pos, coarsen
       edges (pool_edge drops self loops; the forward re-adds them), batch."""
    f32 = jnp.float32
    ones = jnp.ones((pos.shape[0],), f32)
    counts = jax.ops.segment_sum(ones, cluster, num_segments=n_clusters)
    pos_t = jax.ops.segment_sum(pos, cluster, num_segments=n_clusters)
    pos_t = pos_t / jnp.maximum(counts, 1.0)[:, None]
    onehot = jax.nn.one_hot(cluster, n_clusters, dtype=f32)
    adj_c = (onehot.T @ adj @ onehot > 0).astype(f32)
    eye = jnp.eye(n_clusters, dtype=f32)
    adj_c = adj_c * (1.0 - eye) + eye
    batch_t = jax.ops.segment_min(batch_cat, cluster, num_segments=n_clusters)
    return counts, pos_t, adj_c, batch_t


def pool_features(x, cluster, counts, n_clusters):
    xt = jax.ops.segment_max(x, cluster, num_segments=n_clusters)
    return jnp.where(counts[:, None] > 0, xt, 0.0)


def knn_weight_matrix(pos_t, pos, k, batch_t, batch):
    """Dense [N, Nc] row-normalized 1/d^2 knn weights (same-category constraint).
       Equivalent to the knn + scatter_add / sorter / backsorter path (the sort
       and unsort cancel; the 1/den normalization is folded into the rows)."""
    n, nc = pos.shape[0], pos_t.shape[0]
    d2 = jnp.sum((pos[:, None, :] - pos_t[None, :, :]) ** 2, axis=-1)
    d2 = jnp.where(batch[:, None] == batch_t[None, :], d2, jnp.inf)
    neg_sel, idx = jax.lax.top_k(-d2, k)                  # k nearest clusters
    d2_sel = -neg_sel
    w = jnp.where(jnp.isfinite(d2_sel),
                  1.0 / jnp.maximum(d2_sel, 1e-16), 0.0)
    a = jnp.zeros((n, nc), jnp.float32)
    a = a.at[jnp.arange(n)[:, None], idx].set(w)
    den = jnp.sum(a, axis=1, keepdims=True)
    return a / jnp.maximum(den, 1e-16)                    # den==0 guarded -> 0 row


# --------------------------------------------------------------------------
# Cached forward: structure + parameters prepped once, reused every call
# --------------------------------------------------------------------------
class KipfNetDoublePoolTPU:
    """Eval-mode KipfNetDoublePool forward. All structure-dependent tensors
       (laplacians, knn A, BN-folded / stacked / padded weights) are built once
       in __init__ and cached; __call__ runs the fused Pallas kernel."""

    def __init__(self, adj, pos, cluster1, cluster2, categories, params, *,
                 n_clusters1, n_clusters2, knn_k=4, compute_dtype=jnp.bfloat16):
        f32 = jnp.float32
        cdt = compute_dtype
        batch_cat = categories - 1          # data.batch = categories - 1 (batch_size == 1)

        N = adj.shape[0]
        K, fin, H = params["w1"].shape
        fout = params["wm"].shape[-1]
        C1, C2 = n_clusters1, n_clusters2
        NP, C1P, C2P = _round_up(N, 8), _round_up(C1, 8), _round_up(C2, 8)
        NT = NP + C1P + C2P
        HP, FOUTP = _round_up(H, 128), _round_up(fout, 128)
        KF = K * fin

        # ---- graph structure (cached) --------------------------------------
        lap = scaled_laplacian(adj)
        counts1, pos_t1, adj_t1, batch_t1 = pool_structure(
            cluster1, pos, adj, batch_cat, C1)
        counts2, pos_t2, adj_t2, batch_t2 = pool_structure(
            cluster2, pos, adj, batch_cat, C2)
        lap_t1 = scaled_laplacian(adj_t1)
        lap_t2 = scaled_laplacian(adj_t2)

        lap_all = jnp.zeros((NT, NT), f32)
        lap_all = lap_all.at[:N, :N].set(lap)
        lap_all = lap_all.at[NP:NP + C1, NP:NP + C1].set(lap_t1)
        lap_all = lap_all.at[NP + C1P:NP + C1P + C2,
                             NP + C1P:NP + C1P + C2].set(lap_t2)

        a1 = knn_weight_matrix(pos_t1, pos, knn_k, batch_t1, batch_cat)
        a2 = knn_weight_matrix(pos_t2, pos, knn_k, batch_t2, batch_cat)
        # zero columns for padded clusters kill the relu(bias) rows of h2/h3
        a1 = jnp.pad(a1, ((0, NP - N), (0, C1P - C1)))
        a2 = jnp.pad(a2, ((0, NP - N), (0, C2P - C2)))

        # ---- parameters: fold eval-mode BN, stack, pad (cached) ------------
        def fold_bn(w, b, bn):
            gamma, beta, mean, var = bn[0], bn[1], bn[2], bn[3]
            s = gamma * jax.lax.rsqrt(var + 1e-5)
            return w * s[None, None, :], (b - mean) * s + beta

        def wstack(w):                          # [K, fin, H] -> [K*fin, HP]
            return jnp.pad(w, ((0, 0), (0, 0), (0, HP - H))).reshape(KF, HP)

        w1, b1 = fold_bn(params["w1"], params["b1"], params["bn1"])
        w2, b2 = fold_bn(params["w2"], params["b2"], params["bn2"])
        w3, b3 = fold_bn(params["w3"], params["b3"], params["bn3"])
        w_all = jnp.concatenate(
            [wstack(w1), wstack(w2), wstack(w3)], axis=0).astype(cdt)
        b_all = jnp.stack([jnp.pad(b1, (0, HP - H)),
                           jnp.pad(b2, (0, HP - H)),
                           jnp.pad(b3, (0, HP - H))], axis=0).astype(f32)

        wm = params["wm"][0]                    # [3H, fout], K_mix = 1

        def wm_pad(blk):
            return jnp.pad(blk, ((0, HP - H), (0, FOUTP - fout)))

        wm_all = jnp.concatenate([wm_pad(wm[0 * H:1 * H]),
                                  wm_pad(wm[1 * H:2 * H]),
                                  wm_pad(wm[2 * H:3 * H])], axis=0).astype(cdt)
        bm = jnp.pad(params["bm"], (0, FOUTP - fout)).reshape(1, FOUTP).astype(f32)

        self.arrays = {
            "cluster1": cluster1, "cluster2": cluster2,
            "counts1": counts1, "counts2": counts2,
            "lap_all": lap_all, "a1": a1, "a2": a2,
            "w_all": w_all, "b_all": b_all, "wm_all": wm_all, "bm": bm,
        }

        # ---- VMEM budget from the actual padded operand footprint ----------
        op_bytes = sum(_padded_bytes(a.shape, a.dtype)
                       for k, a in self.arrays.items()
                       if k not in ("cluster1", "cluster2",
                                    "counts1", "counts2"))
        op_bytes += _padded_bytes((NT, fin), f32)       # x_all (built per call)
        op_bytes += _padded_bytes((NP, FOUTP), f32)     # output
        vmem_bytes = int(max(2 * op_bytes + (1 << 20), 4 << 20))

        meta = dict(N=N, C1=C1, C2=C2, fin=fin, fout=fout, K=K, NP=NP,
                    C1P=C1P, C2P=C2P, NT=NT, KF=KF, HP=HP, FOUTP=FOUTP,
                    vmem_bytes=vmem_bytes)
        self._fwd = jax.jit(functools.partial(_forward_from_prep, **meta))

    def __call__(self, x):
        return self._fwd(x, self.arrays)


# --------------------------------------------------------------------------
# Pure-JAX reference (f32, HIGHEST precision) for correctness checking
# --------------------------------------------------------------------------
def reference_forward(x, adj, pos, cluster1, cluster2, categories, params,
                      n_clusters1, n_clusters2, knn_k=4):
    batch_cat = categories - 1
    lap = scaled_laplacian(adj)
    counts1, pos_t1, adj_t1, batch_t1 = pool_structure(
        cluster1, pos, adj, batch_cat, n_clusters1)
    counts2, pos_t2, adj_t2, batch_t2 = pool_structure(
        cluster2, pos, adj, batch_cat, n_clusters2)
    lap_t1 = scaled_laplacian(adj_t1)
    lap_t2 = scaled_laplacian(adj_t2)
    x_t0 = pool_features(x, cluster1, counts1, n_clusters1)
    x_t20 = pool_features(x, cluster2, counts2, n_clusters2)
    a1 = knn_weight_matrix(pos_t1, pos, knn_k, batch_t1, batch_cat)
    a2 = knn_weight_matrix(pos_t2, pos, knn_k, batch_t2, batch_cat)

    hp = jax.lax.Precision.HIGHEST

    def cheb_bn_relu(lp, xx, w, b, bn):
        Kk = w.shape[0]
        t_prev = xx
        out = jnp.dot(t_prev, w[0], precision=hp)
        if Kk > 1:
            t_cur = jnp.dot(lp, xx, precision=hp)
            out = out + jnp.dot(t_cur, w[1], precision=hp)
            for k in range(2, Kk):
                t_next = 2.0 * jnp.dot(lp, t_cur, precision=hp) - t_prev
                out = out + jnp.dot(t_next, w[k], precision=hp)
                t_prev, t_cur = t_cur, t_next
        out = out + b
        gamma, beta, mean, var = bn[0], bn[1], bn[2], bn[3]
        out = (out - mean) * gamma * jax.lax.rsqrt(var + 1e-5) + beta
        return jnp.maximum(out, 0.0)

    x1 = cheb_bn_relu(lap, x, params["w1"], params["b1"], params["bn1"])
    xt = cheb_bn_relu(lap_t1, x_t0, params["w2"], params["b2"], params["bn2"])
    xt2 = cheb_bn_relu(lap_t2, x_t20, params["w3"], params["b3"], params["bn3"])
    up1 = jnp.dot(a1, xt, precision=hp)
    up2 = jnp.dot(a2, xt2, precision=hp)
    y_in = jnp.concatenate([x1, up1, up2], axis=1)
    return jnp.dot(y_in, params["wm"][0], precision=hp) + params["bm"]


# --------------------------------------------------------------------------
# Deterministic parameter init (shapes from __init__)
# --------------------------------------------------------------------------
def glorot(key, shape):
    fan_in, fan_out = shape[-2], shape[-1]
    limit = jnp.sqrt(6.0 / (fan_in + fan_out))
    return jax.random.uniform(key, shape, jnp.float32, -limit, limit)


def default_bn(n):
    # gamma=1, beta=0, running_mean=0, running_var=1 (PyTorch BatchNorm1d defaults)
    return jnp.stack([jnp.ones((n,), jnp.float32),
                      jnp.zeros((n,), jnp.float32),
                      jnp.zeros((n,), jnp.float32),
                      jnp.ones((n,), jnp.float32)], axis=0)


if __name__ == "__main__":
    # includeHeading=False, coords=False -> n_input=24, n_output=6.
    # layers=1, K_block=6, K_mix=1, n_hidden=32, knn=4.
    N = 32            # fine-graph nodes
    C1, C2 = 8, 4     # cluster counts for the two poolings
    n_input, n_hidden, n_output = 24, 32, 6
    K_block, K_mix, knn_k = 6, 1, 4

    key = jax.random.PRNGKey(0)
    kx, kp, kw1, kw2, kw3, kwm = jax.random.split(key, 6)

    x = jax.random.normal(kx, (N, n_input), jnp.float32)
    pos = jax.random.uniform(kp, (N, 2), jnp.float32)
    # simple bidirectional ring graph (no self loops, no duplicate edges)
    src = jnp.arange(N, dtype=jnp.int32)
    dst = (src + 1) % N
    edge_index = jnp.stack([jnp.concatenate([src, dst]),
                            jnp.concatenate([dst, src])], axis=0)
    adj = dense_adj(edge_index, N)

    cluster1 = jnp.arange(N, dtype=jnp.int32) // (N // C1)
    cluster2 = jnp.arange(N, dtype=jnp.int32) // (N // C2)
    # categories tensor of ones -> self.categories = categories - 1 = 0 everywhere
    categories = jnp.ones((N,), jnp.int32)

    params = {
        # Kipfblock 1 (fine graph): ChebConv(24 -> 32, K=6) + BN(32)
        "w1": glorot(kw1, (K_block, n_input, n_hidden)),
        "b1": jnp.zeros((n_hidden,), jnp.float32),
        "bn1": default_bn(n_hidden),
        # Kipfblock 2 (pool1 graph)
        "w2": glorot(kw2, (K_block, n_input, n_hidden)),
        "b2": jnp.zeros((n_hidden,), jnp.float32),
        "bn2": default_bn(n_hidden),
        # Kipfblock 3 (pool2 graph)
        "w3": glorot(kw3, (K_block, n_input, n_hidden)),
        "b3": jnp.zeros((n_hidden,), jnp.float32),
        "bn3": default_bn(n_hidden),
        # conv_mix: ChebConv(3*32 -> 6, K=1)
        "wm": glorot(kwm, (K_mix, 3 * n_hidden, n_output)),
        "bm": jnp.zeros((n_output,), jnp.float32),
    }

    y_ref = reference_forward(x, adj, pos, cluster1, cluster2, categories,
                              params, C1, C2, knn_k)

    # 1) f32-compute path vs pure-JAX HIGHEST reference (correctness)
    model_f32 = KipfNetDoublePoolTPU(
        adj, pos, cluster1, cluster2, categories, params,
        n_clusters1=C1, n_clusters2=C2, knn_k=knn_k,
        compute_dtype=jnp.float32)
    y32 = jax.block_until_ready(model_f32(x))
    assert y32.shape == (N, n_output), y32.shape
    assert bool(jnp.allclose(y32, y_ref, atol=5e-2, rtol=5e-2)), \
        float(jnp.max(jnp.abs(y32 - y_ref)))

    # 2) bf16 MXU fast path (weight dots only; lap / knn A stay f32)
    model_bf16 = KipfNetDoublePoolTPU(
        adj, pos, cluster1, cluster2, categories, params,
        n_clusters1=C1, n_clusters2=C2, knn_k=knn_k,
        compute_dtype=jnp.bfloat16)
    y16 = jax.block_until_ready(model_bf16(x))
    assert y16.shape == (N, n_output), y16.shape
    assert bool(jnp.all(jnp.isfinite(y16)))
    assert bool(jnp.allclose(y16, y_ref, atol=2e-1, rtol=1e-1)), \
        float(jnp.max(jnp.abs(y16 - y_ref)))

    # second call reuses the cached structure tensors + compiled kernel
    y16b = jax.block_until_ready(model_bf16(x))
    assert bool(jnp.allclose(y16, y16b))

    print("KERNEL_OK")
</pallas_src>

<mosaic_0001>
module attributes {stable_mosaic.version = 11 : i64} {
  func.func @kernel(%arg0: memref<48x48xf32, #tpu.memory_space<vmem>>, %arg1: memref<48x24xf32, #tpu.memory_space<vmem>>, %arg2: memref<32x8xf32, #tpu.memory_space<vmem>>, %arg3: memref<32x8xf32, #tpu.memory_space<vmem>>, %arg4: memref<432x128xf32, #tpu.memory_space<vmem>>, %arg5: memref<3x128xf32, #tpu.memory_space<vmem>>, %arg6: memref<384x128xf32, #tpu.memory_space<vmem>>, %arg7: memref<1x128xf32, #tpu.memory_space<vmem>>, %arg8: memref<32x128xf32, #tpu.memory_space<vmem>>) attributes {dimension_semantics = [], scalar_prefetch = 0 : i64, scratch_operands = 0 : i64, tpu.core_type = #tpu.core_type<tc>} {
    %c0 = arith.constant 0 : index
    %c0_0 = arith.constant 0 : index
    %0 = vector.load %arg0[%c0, %c0_0] : memref<48x48xf32, #tpu.memory_space<vmem>>, vector<48x48xf32>
    %c0_1 = arith.constant 0 : index
    %c0_2 = arith.constant 0 : index
    %1 = vector.load %arg1[%c0_1, %c0_2] : memref<48x24xf32, #tpu.memory_space<vmem>>, vector<48x24xf32>
    %cst = arith.constant dense<0.000000e+00> : vector<48x24xf32>
    %2 = tpu.matmul %0, %1, %cst {dimension_numbers = #tpu.dot_dimension_numbers<[1], [0], [0], [1], [0, 0, 1, 1], [], []>} : vector<48x48xf32>, vector<48x24xf32>, vector<48x24xf32> -> vector<48x24xf32>
    %cst_3 = arith.constant dense<0.000000e+00> : vector<48x24xf32>
    %3 = tpu.matmul %0, %2, %cst_3 {dimension_numbers = #tpu.dot_dimension_numbers<[1], [0], [0], [1], [0, 0, 1, 1], [], []>} : vector<48x48xf32>, vector<48x24xf32>, vector<48x24xf32> -> vector<48x24xf32>
    %cst_4 = arith.constant 2.000000e+00 : f32
    %4 = vector.broadcast %cst_4 : f32 to vector<48x24xf32>
    %5 = arith.mulf %4, %3 : vector<48x24xf32>
    %6 = arith.subf %5, %1 : vector<48x24xf32>
    %cst_5 = arith.constant dense<0.000000e+00> : vector<48x24xf32>
    %7 = tpu.matmul %0, %6, %cst_5 {dimension_numbers = #tpu.dot_dimension_numbers<[1], [0], [0], [1], [0, 0, 1, 1], [], []>} : vector<48x48xf32>, vector<48x24xf32>, vector<48x24xf32> -> vector<48x24xf32>
    %cst_6 = arith.constant 2.000000e+00 : f32
    %8 = vector.broadcast %cst_6 : f32 to vector<48x24xf32>
    %9 = arith.mulf %8, %7 : vector<48x24xf32>
    %10 = arith.subf %9, %2 : vector<48x24xf32>
    %cst_7 = arith.constant dense<0.000000e+00> : vector<48x24xf32>
    %11 = tpu.matmul %0, %10, %cst_7 {dimension_numbers = #tpu.dot_dimension_numbers<[1], [0], [0], [1], [0, 0, 1, 1], [], []>} : vector<48x48xf32>, vector<48x24xf32>, vector<48x24xf32> -> vector<48x24xf32>
    %cst_8 = arith.constant 2.000000e+00 : f32
    %12 = vector.broadcast %cst_8 : f32 to vector<48x24xf32>
    %13 = arith.mulf %12, %11 : vector<48x24xf32>
    %14 = arith.subf %13, %6 : vector<48x24xf32>
    %cst_9 = arith.constant dense<0.000000e+00> : vector<48x24xf32>
    %15 = tpu.matmul %0, %14, %cst_9 {dimension_numbers = #tpu.dot_dimension_numbers<[1], [0], [0], [1], [0, 0, 1, 1], [], []>} : vector<48x48xf32>, vector<48x24xf32>, vector<48x24xf32> -> vector<48x24xf32>
    %cst_10 = arith.constant 2.000000e+00 : f32
    %16 = vector.broadcast %cst_10 : f32 to vector<48x24xf32>
    %17 = arith.mulf %16, %15 : vector<48x24xf32>
    %18 = arith.subf %17, %10 : vector<48x24xf32>
    %19 = tpu.concatenate %1, %2, %6, %10, %14, %18 in 1 : vector<48x24xf32>, vector<48x24xf32>, vector<48x24xf32>, vector<48x24xf32>, vector<48x24xf32>, vector<48x24xf32> -> vector<48x144xf32>
    %20 = vector.extract_strided_slice %19 {offsets = [0, 0], sizes = [32, 144], strides = [1, 1]} : vector<48x144xf32> to vector<32x144xf32>
    %c0_11 = arith.constant 0 : index
    %c0_12 = arith.constant 0 : index
    %21 = vector.load %arg4[%c0_11, %c0_12] : memref<432x128xf32, #tpu.memory_space<vmem>>, vector<144x128xf32>
    %cst_13 = arith.constant dense<0.000000e+00> : vector<32x128xf32>
    %22 = tpu.matmul %20, %21, %cst_13 {dimension_numbers = #tpu.dot_dimension_numbers<[1], [0], [0], [1], [0, 0, 1, 1], [], []>} : vector<32x144xf32>, vector<144x128xf32>, vector<32x128xf32> -> vector<32x128xf32>
    %c0_14 = arith.constant 0 : index
    %c0_15 = arith.constant 0 : index
    %23 = vector.load %arg5[%c0_14, %c0_15] : memref<3x128xf32, #tpu.memory_space<vmem>>, vector<1x128xf32>
    %24 = vector.broadcast %23 : vector<1x128xf32> to vector<32x128xf32>
    %25 = arith.addf %22, %24 : vector<32x128xf32>
    %cst_16 = arith.constant 0.000000e+00 : f32
    %26 = vector.broadcast %cst_16 : f32 to vector<32x128xf32>
    %27 = arith.maximumf %25, %26 : vector<32x128xf32>
    %28 = vector.extract_strided_slice %19 {offsets = [32, 0], sizes = [8, 144], strides = [1, 1]} : vector<48x144xf32> to vector<8x144xf32>
    %c144 = arith.constant 144 : index
    %c0_17 = arith.constant 0 : index
    %29 = vector.load %arg4[%c144, %c0_17] : memref<432x128xf32, #tpu.memory_space<vmem>>, vector<144x128xf32>
    %cst_18 = arith.constant dense<0.000000e+00> : vector<8x128xf32>
    %30 = tpu.matmul %28, %29, %cst_18 {dimension_numbers = #tpu.dot_dimension_numbers<[1], [0], [0], [1], [0, 0, 1, 1], [], []>} : vector<8x144xf32>, vector<144x128xf32>, vector<8x128xf32> -> vector<8x128xf32>
    %c1 = arith.constant 1 : index
    %c0_19 = arith.constant 0 : index
    %31 = vector.load %arg5[%c1, %c0_19] : memref<3x128xf32, #tpu.memory_space<vmem>>, vector<1x128xf32>
    %32 = vector.broadcast %31 : vector<1x128xf32> to vector<8x128xf32>
    %33 = arith.addf %30, %32 : vector<8x128xf32>
    %cst_20 = arith.constant 0.000000e+00 : f32
    %34 = vector.broadcast %cst_20 : f32 to vector<8x128xf32>
    %35 = arith.maximumf %33, %34 : vector<8x128xf32>
    %36 = vector.extract_strided_slice %19 {offsets = [40, 0], sizes = [8, 144], strides = [1, 1]} : vector<48x144xf32> to vector<8x144xf32>
    %c288 = arith.constant 288 : index
    %c0_21 = arith.constant 0 : index
    %37 = vector.load %arg4[%c288, %c0_21] : memref<432x128xf32, #tpu.memory_space<vmem>>, vector<144x128xf32>
    %cst_22 = arith.constant dense<0.000000e+00> : vector<8x128xf32>
    %38 = tpu.matmul %36, %37, %cst_22 {dimension_numbers = #tpu.dot_dimension_numbers<[1], [0], [0], [1], [0, 0, 1, 1], [], []>} : vector<8x144xf32>, vector<144x128xf32>, vector<8x128xf32> -> vector<8x128xf32>
    %c2 = arith.constant 2 : index
    %c0_23 = arith.constant 0 : index
    %39 = vector.load %arg5[%c2, %c0_23] : memref<3x128xf32, #tpu.memory_space<vmem>>, vector<1x128xf32>
    %40 = vector.broadcast %39 : vector<1x128xf32> to vector<8x128xf32>
    %41 = arith.addf %38, %40 : vector<8x128xf32>
    %cst_24 = arith.constant 0.000000e+00 : f32
    %42 = vector.broadcast %cst_24 : f32 to vector<8x128xf32>
    %43 = arith.maximumf %41, %42 : vector<8x128xf32>
    %c128 = arith.constant 128 : index
    %c0_25 = arith.constant 0 : index
    %44 = vector.load %arg6[%c128, %c0_25] : memref<384x128xf32, #tpu.memory_space<vmem>>, vector<128x128xf32>
    %cst_26 = arith.constant dense<0.000000e+00> : vector<8x128xf32>
    %45 = tpu.matmul %35, %44, %cst_26 {dimension_numbers = #tpu.dot_dimension_numbers<[1], [0], [0], [1], [0, 0, 1, 1], [], []>} : vector<8x128xf32>, vector<128x128xf32>, vector<8x128xf32> -> vector<8x128xf32>
    %c256 = arith.constant 256 : index
    %c0_27 = arith.constant 0 : index
    %46 = vector.load %arg6[%c256, %c0_27] : memref<384x128xf32, #tpu.memory_space<vmem>>, vector<128x128xf32>
    %cst_28 = arith.constant dense<0.000000e+00> : vector<8x128xf32>
    %47 = tpu.matmul %43, %46, %cst_28 {dimension_numbers = #tpu.dot_dimension_numbers<[1], [0], [0], [1], [0, 0, 1, 1], [], []>} : vector<8x128xf32>, vector<128x128xf32>, vector<8x128xf32> -> vector<8x128xf32>
    %c0_29 = arith.constant 0 : index
    %c0_30 = arith.constant 0 : index
    %48 = vector.load %arg6[%c0_29, %c0_30] : memref<384x128xf32, #tpu.memory_space<vmem>>, vector<128x128xf32>
    %cst_31 = arith.constant dense<0.000000e+00> : vector<32x128xf32>
    %49 = tpu.matmul %27, %48, %cst_31 {dimension_numbers = #tpu.dot_dimension_numbers<[1], [0], [0], [1], [0, 0, 1, 1], [], []>} : vector<32x128xf32>, vector<128x128xf32>, vector<32x128xf32> -> vector<32x128xf32>
    %c0_32 = arith.constant 0 : index
    %c0_33 = arith.constant 0 : index
    %50 = vector.load %arg2[%c0_32, %c0_33] : memref<32x8xf32, #tpu.memory_space<vmem>>, vector<32x8xf32>
    %cst_34 = arith.constant dense<0.000000e+00> : vector<32x128xf32>
    %51 = tpu.matmul %50, %45, %cst_34 {dimension_numbers = #tpu.dot_dimension_numbers<[1], [0], [0], [1], [0, 0, 1, 1], [], []>} : vector<32x8xf32>, vector<8x128xf32>, vector<32x128xf32> -> vector<32x128xf32>
    %52 = arith.addf %49, %51 : vector<32x128xf32>
    %c0_35 = arith.constant 0 : index
    %c0_36 = arith.constant 0 : index
    %53 = vector.load %arg3[%c0_35, %c0_36] : memref<32x8xf32, #tpu.memory_space<vmem>>, vector<32x8xf32>
    %cst_37 = arith.constant dense<0.000000e+00> : vector<32x128xf32>
    %54 = tpu.matmul %53, %47, %cst_37 {dimension_numbers = #tpu.dot_dimension_numbers<[1], [0], [0], [1], [0, 0, 1, 1], [], []>} : vector<32x8xf32>, vector<8x128xf32>, vector<32x128xf32> -> vector<32x128xf32>
    %55 = arith.addf %52, %54 : vector<32x128xf32>
    %c0_38 = arith.constant 0 : index
    %c0_39 = arith.constant 0 : index
    %56 = vector.load %arg7[%c0_38, %c0_39] : memref<1x128xf32, #tpu.memory_space<vmem>>, vector<1x128xf32>
    %57 = vector.broadcast %56 : vector<1x128xf32> to vector<32x128xf32>
    %58 = arith.addf %55, %57 : vector<32x128xf32>
    %c0_40 = arith.constant 0 : index
    %c0_41 = arith.constant 0 : index
    %59 = vector.load %arg8[%c0_40, %c0_41] : memref<32x128xf32, #tpu.memory_space<vmem>>, vector<32x128xf32>
    tpu.vector_store %arg8[%c0_40, %c0_41], %58 {strides = array<i32>} : memref<32x128xf32, #tpu.memory_space<vmem>>, vector<32x128xf32>,
    return
  }
}

</mosaic_0001>

<bundles_post_ra>
// kernel: _forward_from_prep.1
= control target key start
LH: loop header
LB: loop body
LE: loop exit
PB: predicated region body
PF: predicated region fallthrough
CT: control target
= control target key end

     0   :  { %13 = vsyncpa [#allocation3], 0  ;;  %s2827_s0 = inlined_call_operand.vmem [shape: f32[48,48], index: 0, kind: input, shape index: {}]   ;;  %s2828_s1 = inlined_call_operand.vmem [shape: f32[48,24], index: 1, kind: input, shape index: {}]   ;;  %s2829_s2 = inlined_call_operand.vmem [shape: f32[32,8], index: 2, kind: input, shape index: {}]   ;;  %s2830_s3 = inlined_call_operand.vmem [shape: f32[32,8], index: 3, kind: input, shape index: {}]   ;;  %s2831_s4 = inlined_call_operand.hbm [shape: f32[432,128], index: 4, kind: input, shape index: {}]   ;;  %s2832_s5 = inlined_call_operand.vmem [shape: f32[3,128], index: 5, kind: input, shape index: {}]   ;;  %s2833_s6 = inlined_call_operand.hbm [shape: f32[384,128], index: 6, kind: input, shape index: {}]   ;;  %s2834_s7 = inlined_call_operand.vmem [shape: f32[1,128], index: 7, kind: input, shape index: {}]   ;;  %s2835_s8 = inlined_call_operand.vmem [shape: f32[32,128], index: 8, kind: output, shape index: {}]  }
   0x1   :  { %14 = vsyncpa [#allocation5], 0  ;;  %s2319_s27 = smov [#allocation2]   ;;  %s2271_s9 = scalar_lea.hbm %s2831_s4, 6912 }
   0x2   :  { %s28_s28 = sshll.u32 %s2319_s27, 4  ;;  %p2272_p0 = scmp.ne.s32.totalorder %s2831_s4, %s2271_s9  ;;  %s29_s28 = int_to_ptr.vmem [resolvable:$true] %s28_s28 }
   0x3   :  { %p2275_p1 = scmp.lt.u32.totalorder %s2271_s9, %s2831_s4 }
   0x5   :  { %p2277_p2 = pnand %p2275_p1, %p2272_p0 }
   0x7   :  { %2280 = shalt.err (!%p2277_p2)
}
   0x8   :  { %s2281_s14 = scalar_lea.vmem %s29_s28, 6912  ;;  %p2286_p4 = scmp.lt.s32.totalorder %s29_s28, %s29_s28 }
   0x9   :  { %p2282_p3 = scmp.ne.s32.totalorder %s29_s28, %s2281_s14  ;;  %p2287_p5 = scmp.lt.s32.totalorder %s2281_s14, %s2281_s14 }
   0xb   :  { %p2288_p6 = por %p2287_p5, %p2286_p4 }
   0xd   :  { %p2289_p7 = pnand %p2288_p6, %p2282_p3 }
   0xf   :  { %2292 = shalt.err (!%p2289_p7)
}
  0x10   :  { %s2320_s15 = smov 128   ;;  %s2321_s16 = smov 8  }
  0x11   :  { %34 = dma.hbm_to_vmem [thread:$0]  %s2831_s4, 6912, %s29_s28, [#allocation3], %s2320_s15, %s2320_s15, %s2321_s16  }
  0x12   :  { %s2322_s19 = smov [#allocation4]   ;;  %s2293_s23 = scalar_lea.hbm %s2833_s6, 6144 }
  0x13   :  { %s42_s20 = sshll.u32 %s2322_s19, 4  ;;  %p2294_p8 = scmp.ne.s32.totalorder %s2833_s6, %s2293_s23  ;;  %s43_s20 = int_to_ptr.vmem [resolvable:$true] %s42_s20 }
  0x14   :  { %p2297_p9 = scmp.lt.u32.totalorder %s2293_s23, %s2833_s6 }
  0x16   :  { %p2299_p10 = pnand %p2297_p9, %p2294_p8 }
  0x18   :  { %2302 = shalt.err (!%p2299_p10)
}
  0x19   :  { %s2303_s29 = scalar_lea.vmem %s43_s20, 6144  ;;  %p2308_p12 = scmp.lt.s32.totalorder %s43_s20, %s43_s20 }
  0x1a   :  { %p2304_p11 = scmp.ne.s32.totalorder %s43_s20, %s2303_s29  ;;  %p2309_p13 = scmp.lt.s32.totalorder %s2303_s29, %s2303_s29 }
  0x1c   :  { %p2310_p0 = por %p2309_p13, %p2308_p12 }
  0x1e   :  { %p2311_p1 = pnand %p2310_p0, %p2304_p11 }
  0x20   :  { %2314 = shalt.err (!%p2311_p1)
}
  0x21   :  { %48 = dma.hbm_to_vmem [thread:$0]  %s2833_s6, 6144, %s43_s20, [#allocation5], %s2320_s15, %s2320_s15, %s2321_s16  }
  0x22   :  { %2315 = dma.done.wait [#allocation3], 6912  }
  0x23   :  { %2316 = vsyncadd [#allocation3], 4294960384 }
  0x24   :  { %2317 = dma.done.wait [#allocation5], 6144  }
  0x25   :  { %2318 = vsyncadd [#allocation5], 4294961152  ;;  %v2403_v0 = vld [vmem:[%s2828_s1] sm:$0xff]  ;;  %v2408_v1 = vld [vmem:[%s2828_s1 + $0x8] sm:$0xff]  ;;  %vm69_vm0 = vcmask 392192   ;;  %s2324_s28 = smov 48  }
  0x26   :  { %v2413_v2 = vld [vmem:[%s2828_s1 + $0x10] sm:$0xff]  ;;  %v1980_v3 = vpack.c.bf16 %v2408_v1, %v2403_v0  ;;  %v2420_v4 = vld [vmem:[%s2828_s1 + $0x18] sm:$0xff]  ;;  %v2427_v6 = vld [vmem:[%s2828_s1 + $0x20] sm:$0xff]  ;;  %s2325_s30 = smov 72   ;;  %s2326_s9 = smov 96   ;;  %vm731_vm1 = vcmask 195584  }
  0x27   :  { %v1984_v5 = vpack.c.bf16 %v2420_v4, %v2413_v2  ;;  %v2432_v7 = vld [vmem:[%s2828_s1 + $0x28] sm:$0xff]  ;;  %v2437_v8 = vld [vmem:[%s2827_s0] sm:$0xff]  ;;  %v2453_v11 = vld [vmem:[%s2827_s0 + $0x10] sm:$0xff]  ;;  %s2328_s10 = smov 120   ;;  %vm744_vm2 = vcmask 588800   ;;  %vm751_vm3 = vcmask 785408  }
  0x28   :  { %1981 = vmatprep.subr.bf16.mxu1 %v1980_v3  ;;  %1763 = vmatprep.mubr.msk.f32.mxu1 %vm69_vm0, %v2437_v8  ;;  %v1988_v9 = vpack.c.bf16 %v2432_v7, %v2427_v6  ;;  %v2448_v10 = vld [vmem:[%s2827_s0 + $0x8] sm:$0xff]  ;;  %v2462_v12 = vld [vmem:[%s2827_s0 + $0x18] sm:$0xff]  ;;  %v2467_v13 = vld [vmem:[%s2827_s0 + $0x20] sm:$0xff]  ;;  %vm758_vm4 = vcmask 982016   ;;  %vm788_vm5 = vcmask 130048   ;;  %vm2329_vm6 = vmmov 0  }
  0x29   :  { %1983 = vmatpush3.bf16.msra.mxu1 %v1980_v3  ;;  %1805 = vmatprep.mubr.msk.f32.mxu0 %vm69_vm0, %v2437_v8  ;;  %v2476_v14 = vld [vmem:[%s2827_s0 + $0x28] sm:$0xff]  ;;  %s2323_s0 = smov 24   ;;  %vm1270_vm7 = vcmask 64512  }
  0x2a   :  { %1985 = vmatprep.subr.bf16.mxu1 %v1984_v5 }
  0x2d   :  { %1987 = vmatpush3.bf16.msra.mxu1 %v1984_v5 }
  0x2e   :  { %1989 = vmatprep.subr.bf16.mxu1 %v1988_v9 }
  0x31   :  { %1991 = vmatpush3.bf16.msra.mxu1 %v1988_v9 }
  0x34   :  { %1764 = vmatmul.mubr.msk.f32.vlgmr.msra.gmra.mrb[0].mxu1 %vm69_vm0, %v2448_v10 }
  0x35   :  { %1766 = vmatprep.mubr.msk.f32.mxu1 %vm69_vm0, %v2453_v11 }
  0x38   :  { %1767 = vmatmul.mubr.msk.f32.gmra.mrb[2].mxu1 %vm69_vm0, %v2462_v12 }
  0x39   :  { %1769 = vmatprep.mubr.msk.f32.mxu1 %vm69_vm0, %v2467_v13 }
  0x3c   :  { %1770 = vmatmul.mubr.msk.f32.gmra.mrb[4].mxu1 %vm69_vm0, %v2476_v14 }
  0x3d   :  { %1784 = vmatprep.mubr.msk.f32.mxu1 %vm69_vm0, %v2437_v8 }
 0x107   :  { %v2482_v15 = vpop.f32.mrb[0].mxu1 }
 0x108   :  { %v2484_v16 = vpop.f32.mrb[1].mxu1 }
 0x109   :  { %v1992_v17 = vpack.c.bf16 %v2482_v15, %v2484_v16 }
 0x10b   :  { %v2488_v18 = vpop.f32.mrb[2].mxu1  ;;  %1993 = vmatprep.subr.bf16.mxu1 %v1992_v17 }
 0x10c   :  { %v2490_v19 = vpop.f32.mrb[3].mxu1  ;;  %1995 = vmatpush3.bf16.msra.mxu1 %v1992_v17 }
 0x10d   :  { %v2241_v20 = vpack.i.bf16 %v2490_v19, %v2482_v15  ;;  %v1996_v21 = vpack.c.bf16 %v2488_v18, %v2490_v19 }
 0x10f   :  { %v2496_v22 = vpop.f32.mrb[4].mxu1  ;;  %1997 = vmatprep.subr.bf16.mxu1 %v1996_v21 }
 0x110   :  { %v2261_v23 = vpack.i.bf16 %v2496_v22, %v2488_v18  ;;  %v2500_v24 = vpop.f32.mrb[5].mxu1  ;;  %1999 = vmatpush3.bf16.msra.mxu1 %v1996_v21 }
 0x111   :  { %v2000_v25 = vpack.c.bf16 %v2496_v22, %v2500_v24  ;;  %v2221_v26 = vpack.i.bf16 %v2484_v16, %v2500_v24 }
 0x113   :  { %2222 = vrot.lane.b32.xlu0 %v2221_v26, %s2323_s0  ;;  %2001 = vmatprep.subr.bf16.mxu1 %v2000_v25 }
 0x114   :  { %2003 = vmatpush3.bf16.msra.mxu1 %v2000_v25 }
 0x117   :  { %1785 = vmatmul.mubr.msk.f32.vlgmr.msra.gmra.mrb[6].mxu1 %vm69_vm0, %v2448_v10 }
 0x118   :  { %1787 = vmatprep.mubr.msk.f32.mxu1 %vm69_vm0, %v2453_v11 }
 0x11b   :  { %1788 = vmatmul.mubr.msk.f32.gmra.mrb[8].mxu1 %vm69_vm0, %v2462_v12 }
 0x11c   :  { %1790 = vmatprep.mubr.msk.f32.mxu1 %vm69_vm0, %v2467_v13 }
 0x11f   :  { %1791 = vmatmul.mubr.msk.f32.gmra.mrb[10].mxu1 %vm69_vm0, %v2476_v14 }
 0x120   :  { %1826 = vmatprep.mubr.msk.f32.mxu1 %vm69_vm0, %v2437_v8 }
 0x1ea   :  { %v1786_v27 = vpop.f32.mrb[6].mxu1 }
 0x1eb   :  { %v279_v28 = vmul.f32 2.0, %v1786_v27  ;;  %v249_v29 = vpop.f32.mrb[7].mxu1 }
 0x1ec   :  { %v278_v30 = vmul.f32 2.0, %v249_v29 }
 0x1ed   :  { %v2520_v31 = vsub.f32 %v279_v28, %v2408_v1 }
 0x1ee   :  { %v2523_v32 = vsub.f32 %v278_v30, %v2403_v0  ;;  %v1789_v33 = vpop.f32.mrb[8].mxu1 }
 0x1ef   :  { %v281_v34 = vmul.f32 2.0, %v1789_v33  ;;  %v259_v35 = vpop.f32.mrb[9].mxu1 }
 0x1f0   :  { %v280_v36 = vmul.f32 2.0, %v259_v35  ;;  %v2004_v37 = vpack.c.bf16 %v2520_v31, %v2523_v32 }
 0x1f1   :  { %v2528_v38 = vsub.f32 %v281_v34, %v2420_v4 }
 0x1f2   :  { %v2531_v39 = vsub.f32 %v280_v36, %v2413_v2  ;;  %v1792_v40 = vpop.f32.mrb[10].mxu1  ;;  %2005 = vmatprep.subr.bf16.mxu0 %v2004_v37 }
 0x1f3   :  { %v283_v41 = vmul.f32 2.0, %v1792_v40  ;;  %v269_v42 = vpop.f32.mrb[11].mxu1  ;;  %2007 = vmatpush3.bf16.msra.mxu0 %v2004_v37 }
 0x1f4   :  { %v282_v43 = vmul.f32 2.0, %v269_v42  ;;  %v2008_v44 = vpack.c.bf16 %v2528_v38, %v2531_v39 }
 0x1f5   :  { %v2536_v45 = vsub.f32 %v283_v41, %v2432_v7 }
 0x1f6   :  { %v2539_v46 = vsub.f32 %v282_v43, %v2427_v6  ;;  %2009 = vmatprep.subr.bf16.mxu0 %v2008_v44 }
 0x1f7   :  { %2011 = vmatpush3.bf16.msra.mxu0 %v2008_v44 }
 0x1f8   :  { %v2226_v47 = vpack.i.bf16 %v2523_v32, %v2539_v46  ;;  %v2012_v48 = vpack.c.bf16 %v2536_v45, %v2539_v46 }
 0x1fa   :  { %2227 = vrot.lane.b32.xlu0 %v2226_v47, %s2324_s28  ;;  %2013 = vmatprep.subr.bf16.mxu0 %v2012_v48 }
 0x1fb   :  { %2015 = vmatpush3.bf16.msra.mxu0 %v2012_v48 }
 0x1fe   :  { %1806 = vmatmul.mubr.msk.f32.vlgmr.msra.gmra.mrb[0].mxu0 %vm69_vm0, %v2448_v10 }
 0x1ff   :  { %1808 = vmatprep.mubr.msk.f32.mxu0 %vm69_vm0, %v2453_v11 }
 0x202   :  { %1809 = vmatmul.mubr.msk.f32.gmra.mrb[2].mxu0 %vm69_vm0, %v2462_v12 }
 0x203   :  { %1811 = vmatprep.mubr.msk.f32.mxu0 %vm69_vm0, %v2467_v13 }
 0x206   :  { %1812 = vmatmul.mubr.msk.f32.gmra.mrb[4].mxu0 %vm69_vm0, %v2476_v14 }
 0x207   :  { %1847 = vmatprep.mubr.msk.f32.mxu0 %vm69_vm0, %v2437_v8 }
 0x2d1   :  { %v1807_v49 = vpop.f32.mrb[0].mxu0 }
 0x2d2   :  { %v386_v50 = vmul.f32 2.0, %v1807_v49  ;;  %v356_v51 = vpop.f32.mrb[1].mxu0 }
 0x2d3   :  { %v385_v52 = vmul.f32 2.0, %v356_v51 }
 0x2d4   :  { %v2559_v53 = vsub.f32 %v386_v50, %v2482_v15 }
 0x2d5   :  { %v2562_v54 = vsub.f32 %v385_v52, %v2484_v16  ;;  %v1810_v55 = vpop.f32.mrb[2].mxu0  ;;  %v766_v52 = vld [vmem:[#allocation2 + $0x8] sm:$0xff] }
 0x2d6   :  { %v388_v56 = vmul.f32 2.0, %v1810_v55  ;;  %v366_v57 = vpop.f32.mrb[3].mxu0  ;;  %v767_v55 = vld [vmem:[#allocation2 + $0x10] sm:$0xff] }
 0x2d7   :  { %v387_v58 = vmul.f32 2.0, %v366_v57  ;;  %v2016_v59 = vpack.c.bf16 %v2559_v53, %v2562_v54 }
 0x2d8   :  { %v2567_v60 = vsub.f32 %v388_v56, %v2488_v18  ;;  %v2327_v56 = vmov 0.0|0.0  }
 0x2d9   :  { %v2570_v61 = vsub.f32 %v387_v58, %v2490_v19  ;;  %v1813_v62 = vpop.f32.mrb[4].mxu0  ;;  %2017 = vmatprep.subr.bf16.mxu1 %v2016_v59  ;;  %v887_v58 = vld [vmem:[#allocation2 + $0x98] sm:$0xff] }
 0x2da   :  { %v390_v63 = vmul.f32 2.0, %v1813_v62  ;;  %v376_v3 = vpop.f32.mrb[5].mxu0  ;;  %2019 = vmatpush3.bf16.msra.mxu1 %v2016_v59  ;;  %v888_v62 = vld [vmem:[#allocation2 + $0xa0] sm:$0xff] }
 0x2db   :  { %v389_v5 = vmul.f32 2.0, %v376_v3  ;;  %v2020_v8 = vpack.c.bf16 %v2567_v60, %v2570_v61 }
 0x2dc   :  { %v2575_v9 = vsub.f32 %v390_v63, %v2496_v22  ;;  %v770_v63 = vld [vmem:[#allocation2 + $0x28] sm:$0xff] }
 0x2dd   :  { %v2578_v16 = vsub.f32 %v389_v5, %v2500_v24  ;;  %2021 = vmatprep.subr.bf16.mxu1 %v2020_v8  ;;  %v890_v5 = vld [vmem:[#allocation2 + $0xb0] sm:$0xff] }
 0x2de   :  { %2023 = vmatpush3.bf16.msra.mxu1 %v2020_v8  ;;  %v891_v8 = vld [vmem:[#allocation2 + $0xb8] sm:$0xff] }
 0x2df   :  { %v2231_v17 = vpack.i.bf16 %v2562_v54, %v2578_v16  ;;  %v2024_v21 = vpack.c.bf16 %v2575_v9, %v2578_v16 }
 0x2e1   :  { %2232 = vrot.lane.b32.xlu1 %v2231_v17, %s2325_s30  ;;  %2025 = vmatprep.subr.bf16.mxu1 %v2024_v21 }
 0x2e2   :  { %2027 = vmatpush3.bf16.msra.mxu1 %v2024_v21  ;;  %v771_v21 = vld [vmem:[#allocation2 + $0x30] sm:$0xff] }
 0x2e3   :  { %2040 = vmatprep.subr.bf16.mxu1 %v2327_v56 }
 0x2e5   :  { %1827 = vmatmul.mubr.msk.f32.vlgmr.msra.gmra.mrb[12].mxu1 %vm69_vm0, %v2448_v10 }
 0x2e6   :  { %1829 = vmatprep.mubr.msk.f32.mxu1 %vm69_vm0, %v2453_v11 }
 0x2e9   :  { %1830 = vmatmul.mubr.msk.f32.gmra.mrb[14].mxu1 %vm69_vm0, %v2462_v12 }
 0x2ea   :  { %1832 = vmatprep.mubr.msk.f32.mxu1 %vm69_vm0, %v2467_v13 }
 0x2ed   :  { %1833 = vmatmul.mubr.msk.f32.gmra.mrb[16].mxu1 %vm69_vm0, %v2476_v14 }
 0x3b8   :  { %v1828_v24 = vpop.f32.mrb[12].mxu1 }
 0x3b9   :  { %v493_v25 = vmul.f32 2.0, %v1828_v24  ;;  %v463_v26 = vpop.f32.mrb[13].mxu1  ;;  %v772_v24 = vld [vmem:[#allocation2 + $0x38] sm:$0xff] }
 0x3ba   :  { %v492_v27 = vmul.f32 2.0, %v463_v26  ;;  %v892_v26 = vld [vmem:[#allocation2 + $0xc0] sm:$0xff] }
 0x3bb   :  { %v2596_v28 = vsub.f32 %v493_v25, %v2520_v31  ;;  %v2074_v25 = vpack.c.bf16 %v891_v8, %v890_v5  ;;  %v902_v8 = vld [vmem:[#allocation2 + $0x110] sm:$0xff] }
 0x3bc   :  { %v498_v29 = vsub.f32 %v492_v27, %v2523_v32  ;;  %v1831_v30 = vpop.f32.mrb[14].mxu1  ;;  %v893_v27 = vld [vmem:[#allocation2 + $0xc8] sm:$0xff] }
 0x3bd   :  { %v495_v33 = vmul.f32 2.0, %v1831_v30  ;;  %v473_v34 = vpop.f32.mrb[15].mxu1  ;;  %v773_v30 = vld [vmem:[#allocation2 + $0x40] sm:$0xff] }
 0x3be   :  { %v494_v35 = vmul.f32 2.0, %v473_v34  ;;  %v2028_v36 = vpack.c.bf16 %v2596_v28, %v498_v29  ;;  %v2077_v34 = vpack.c.bf16 %v893_v27, %v892_v26 }
 0x3bf   :  { %v2601_v37 = vsub.f32 %v495_v33, %v2528_v38  ;;  %v774_v33 = vld [vmem:[#allocation2 + $0x48] sm:$0xff] }
 0x3c0   :  { %v2604_v40 = vsub.f32 %v494_v35, %v2531_v39  ;;  %v1834_v41 = vpop.f32.mrb[16].mxu1  ;;  %2029 = vmatprep.subr.bf16.mxu0 %v2028_v36  ;;  %v894_v35 = vld [vmem:[#allocation2 + $0xd0] sm:$0xff] }
 0x3c1   :  { %v497_v42 = vmul.f32 2.0, %v1834_v41  ;;  %v483_v43 = vpop.f32.mrb[17].mxu1  ;;  %2031 = vmatpush3.bf16.msra.mxu0 %v2028_v36  ;;  %v895_v36 = vld [vmem:[#allocation2 + $0xd8] sm:$0xff]  ;;  %v2053_v41 = vpack.c.bf16 %v774_v33, %v773_v30 }
 0x3c2   :  { %v496_v44 = vmul.f32 2.0, %v483_v43  ;;  %v2032_v32 = vpack.c.bf16 %v2601_v37, %v2604_v40  ;;  %v2256_v47 = vpack.i.bf16 %v2604_v40, %v2596_v28  ;;  %v776_v43 = vld [vmem:[#allocation2 + $0x58] sm:$0xff] }
 0x3c3   :  { %v2611_v48 = vsub.f32 %v497_v42, %v2536_v45  ;;  %v775_v42 = vld [vmem:[#allocation2 + $0x50] sm:$0xff] }
 0x3c4   :  { %v502_v49 = vsub.f32 %v496_v44, %v2539_v46  ;;  %2033 = vmatprep.subr.bf16.mxu0 %v2032_v32  ;;  %v765_v46 = vld [vmem:[#allocation2] sm:$0xff]  ;;  %v2080_v44 = vpack.c.bf16 %v895_v36, %v894_v35 }
 0x3c5   :  { %2035 = vmatpush3.bf16.msra.mxu0 %v2032_v32  ;;  %v2041_v57 = vpack.c.bf16 %v766_v52, %v765_v46  ;;  %v896_v32 = vld [vmem:[#allocation2 + $0xe0] sm:$0xff]  ;;  %v778_v46 = vld [vmem:[#allocation2 + $0x68] sm:$0xff] }
 0x3c6   :  { %v2236_v50 = vpack.i.bf16 %v498_v29, %v502_v49  ;;  %v2036_v51 = vpack.c.bf16 %v2611_v48, %v502_v49  ;;  %v2050_v29 = vpack.c.bf16 %v772_v24, %v771_v21  ;;  %v897_v49 = vld [vmem:[#allocation2 + $0xe8] sm:$0xff] }
 0x3c7   :  { %2042 = vmatpush1.bf16.msra.mxu1 %v2041_v57  ;;  %v2083_v52 = vpack.c.bf16 %v897_v49, %v896_v32  ;;  %v899_v57 = vld [vmem:[#allocation2 + $0xf8] sm:$0xff] }
 0x3c8   :  { %2237 = vrot.lane.b32.xlu1 %v2236_v50, %s2326_s9  ;;  %2037 = vmatprep.subr.bf16.mxu0 %v2036_v51  ;;  %v2056_v50 = vpack.c.bf16 %v776_v43, %v775_v42  ;;  %v983_v42 = vld [vmem:[#allocation2 + $0x128] sm:$0xff] }
 0x3c9   :  { %2039 = vmatpush3.bf16.msra.mxu0 %v2036_v51  ;;  %2043 = vmatprep.subr.bf16.mxu1 %v2327_v56  ;;  %v777_v51 = vld [vmem:[#allocation2 + $0x60] sm:$0xff] }
 0x3ca   :  { %2067 = vmatprep.subr.bf16.mxu0 %v2327_v56 }
 0x3cc   :  { %1848 = vmatmul.mubr.msk.f32.vlgmr.msra.gmra.mrb[6].mxu0 %vm69_vm0, %v2448_v10  ;;  %v768_v10 = vld [vmem:[#allocation2 + $0x18] sm:$0xff] }
 0x3cd   :  { %1850 = vmatprep.mubr.msk.f32.mxu0 %vm69_vm0, %v2453_v11  ;;  %v886_v11 = vld [vmem:[#allocation2 + $0x90] sm:$0xff] }
 0x3ce   :  { %v2068_v59 = vpack.c.bf16 %v887_v58, %v886_v11  ;;  %v779_v11 = vld [vmem:[#allocation2 + $0x70] sm:$0xff]  ;;  %v780_v58 = vld [vmem:[#allocation2 + $0x78] sm:$0xff] }
 0x3d0   :  { %1851 = vmatmul.mubr.msk.f32.gmra.mrb[8].mxu0 %vm69_vm0, %v2462_v12  ;;  %v2044_v12 = vpack.c.bf16 %v768_v10, %v767_v55  ;;  %v898_v55 = vld [vmem:[#allocation2 + $0xf0] sm:$0xff]  ;;  %v2059_v10 = vpack.c.bf16 %v778_v46, %v777_v51  ;;  %v985_v51 = vld [vmem:[#allocation2 + $0x138] sm:$0xff] }
 0x3d1   :  { %1853 = vmatprep.mubr.msk.f32.mxu0 %vm69_vm0, %v2467_v13  ;;  %v889_v13 = vld [vmem:[#allocation2 + $0xa8] sm:$0xff]  ;;  %2069 = vmatpush1.bf16.msra.mxu0 %v2068_v59  ;;  %v2062_v59 = vpack.c.bf16 %v780_v58, %v779_v11 }
 0x3d2   :  { %v2071_v3 = vpack.c.bf16 %v889_v13, %v888_v62  ;;  %2070 = vmatprep.subr.bf16.mxu0 %v2327_v56  ;;  %2045 = vmatpush1.bf16.msra.mxu1 %v2044_v12  ;;  %v2086_v12 = vpack.c.bf16 %v899_v57, %v898_v55  ;;  %v781_v62 = vld [vmem:[#allocation2 + $0x80] sm:$0xff]  ;;  %v782_v13 = vld [vmem:[#allocation2 + $0x88] sm:$0xff] }
 0x3d3   :  { %2046 = vmatprep.subr.bf16.mxu1 %v2327_v56 }
 0x3d4   :  { %1854 = vmatmul.mubr.msk.f32.gmra.mrb[10].mxu0 %vm69_vm0, %v2476_v14  ;;  %v769_v14 = vld [vmem:[#allocation2 + $0x20] sm:$0xff] }
 0x3d5   :  { %v2047_v17 = vpack.c.bf16 %v770_v63, %v769_v14  ;;  %2072 = vmatpush1.bf16.msra.mxu0 %v2071_v3  ;;  %v2065_v14 = vpack.c.bf16 %v782_v13, %v781_v62  ;;  %v900_v63 = vld [vmem:[#allocation2 + $0x100] sm:$0xff]  ;;  %v901_v3 = vld [vmem:[#allocation2 + $0x108] sm:$0xff]  ;;  %v1079_v62 = vld [vmem:[#allocation4 + $0x88] sm:$0xff] }
 0x3d6   :  { %2073 = vmatprep.subr.bf16.mxu0 %v2327_v56  ;;  %v2089_v5 = vpack.c.bf16 %v901_v3, %v900_v63 }
 0x3d7   :  { %2048 = vmatpush1.bf16.msra.mxu1 %v2047_v17  ;;  %v903_v17 = vld [vmem:[#allocation2 + $0x118] sm:$0xff] }
 0x3d8   :  { %2049 = vmatprep.subr.bf16.mxu1 %v2327_v56  ;;  %v2092_v21 = vpack.c.bf16 %v903_v17, %v902_v8 }
 0x3d9   :  { %2075 = vmatpush1.bf16.msra.mxu0 %v2074_v25 }
 0x3da   :  { %2076 = vmatprep.subr.bf16.mxu0 %v2327_v56 }
 0x3db   :  { %2051 = vmatpush1.bf16.msra.mxu1 %v2050_v29 }
 0x3dc   :  { %2052 = vmatprep.subr.bf16.mxu1 %v2327_v56 }
 0x3dd   :  { %2078 = vmatpush1.bf16.msra.mxu0 %v2077_v34  ;;  %v2246_v34 = vpack.i.bf16 %v2531_v39, %v2520_v31  ;;  %v2266_v39 = vpack.i.bf16 %v2536_v45, %v2528_v38  ;;  %v2223_v38 = vpop.permute.xlu0 %2222  ;;  %v2233_v45 = vpop.permute.xlu1 %2232 }
 0x3de   :  { %2079 = vmatprep.subr.bf16.mxu0 %v2327_v56  ;;  %v2235_v40 = vunpack.i.h.bf16 %v2233_v45  ;;  %v2224_v46 = vunpack.i.l.bf16 %v2223_v38 }
 0x3df   :  { %2054 = vmatpush1.bf16.msra.mxu1 %v2053_v41 }
 0x3e0   :  { %2055 = vmatprep.subr.bf16.mxu1 %v2327_v56  ;;  %v736_v13 = vsel %vm731_vm1, %v2427_v6, %v2224_v46  ;;  %v1080_v6 = vld [vmem:[#allocation4 + $0x90] sm:$0xff]  ;;  %v1087_v46 = vld [vmem:[#allocation4 + $0xc8] sm:$0xff] }
 0x3e1   :  { %2081 = vmatpush1.bf16.msra.mxu0 %v2080_v44 }
 0x3e2   :  { %2082 = vmatprep.subr.bf16.mxu0 %v2327_v56 }
 0x3e3   :  { %2057 = vmatpush1.bf16.msra.mxu1 %v2056_v50  ;;  %v984_v50 = vld [vmem:[#allocation2 + $0x130] sm:$0xff] }
 0x3e4   :  { %2058 = vmatprep.subr.bf16.mxu1 %v2327_v56  ;;  %v2098_v57 = vpack.c.bf16 %v985_v51, %v984_v50  ;;  %v1086_v51 = vld [vmem:[#allocation4 + $0xc0] sm:$0xff] }
 0x3e5   :  { %2084 = vmatpush1.bf16.msra.mxu0 %v2083_v52 }
 0x3e6   :  { %2085 = vmatprep.subr.bf16.mxu0 %v2327_v56 }
 0x3e7   :  { %2060 = vmatpush1.bf16.msra.mxu1 %v2059_v10  ;;  %v986_v10 = vld [vmem:[#allocation2 + $0x140] sm:$0xff] }
 0x3e8   :  { %2061 = vmatprep.subr.bf16.mxu1 %v2327_v56 }
 0x3e9   :  { %2087 = vmatpush1.bf16.msra.mxu0 %v2086_v12  ;;  %v987_v12 = vld [vmem:[#allocation2 + $0x148] sm:$0xff] }
 0x3ea   :  { %2088 = vmatprep.subr.bf16.mxu0 %v2327_v56  ;;  %v2101_v3 = vpack.c.bf16 %v987_v12, %v986_v10  ;;  %v996_v12 = vld [vmem:[#allocation2 + $0x190] sm:$0xff] }
 0x3eb   :  { %2063 = vmatpush1.bf16.msra.mxu1 %v2062_v59  ;;  %v1078_v59 = vld [vmem:[#allocation4 + $0x80] sm:$0xff] }
 0x3ec   :  { %2064 = vmatprep.subr.bf16.mxu1 %v2327_v56 }
 0x3ed   :  { %2090 = vmatpush1.bf16.msra.mxu0 %v2089_v5  ;;  %v2122_v5 = vpack.c.bf16 %v1079_v62, %v1078_v59  ;;  %v997_v59 = vld [vmem:[#allocation2 + $0x198] sm:$0xff]  ;;  %v2134_v62 = vpack.c.bf16 %v1087_v46, %v1086_v51 }
 0x3ee   :  { %2091 = vmatprep.subr.bf16.mxu0 %v2327_v56  ;;  %v1177_v51 = vld [vmem:[#allocation4 + $0x168] sm:$0xff] }
 0x3ef   :  { %2066 = vmatpush1.bf16.msra.mxu1 %v2065_v14 }
 0x3f0   :  { %2094 = vmatprep.subr.bf16.mxu1 %v2327_v56 }
 0x3f1   :  { %2093 = vmatpush1.bf16.msra.mxu0 %v2092_v21 }
 0x3f2   :  { %2121 = vmatprep.subr.bf16.mxu0 %v2327_v56 }
 0x43a   :  { %v2238_v28 = vpop.permute.xlu1 %2237 }
 0x43b   :  { %v2239_v11 = vunpack.i.l.bf16 %v2238_v28 }
 0x49f   :  { %v1849_v24 = vpop.f32.mrb[6].mxu0 }
 0x4a0   :  { %v570_v25 = vpop.f32.mrb[7].mxu0  ;;  %v600_v31 = vmul.f32 2.0, %v1849_v24  ;;  %v988_v24 = vld [vmem:[#allocation2 + $0x150] sm:$0xff] }
 0x4a1   :  { %v599_v26 = vmul.f32 2.0, %v570_v25  ;;  %v989_v25 = vld [vmem:[#allocation2 + $0x158] sm:$0xff] }
 0x4a3   :  { %v605_v27 = vsub.f32 %v599_v26, %v2562_v54  ;;  %v1852_v29 = vpop.f32.mrb[8].mxu0  ;;  %v2251_v54 = vpack.i.bf16 %v2570_v61, %v2559_v53 }
 0x4a4   :  { %v580_v30 = vpop.f32.mrb[9].mxu0 }
 0x4a5   :  { %713 = vrot.lane.b32.xlu1 %v605_v27, %s2328_s10  ;;  %v601_v18 = vmul.f32 2.0, %v580_v30  ;;  %v1081_v27 = vld [vmem:[#allocation4 + $0x98] sm:$0xff] }
 0x4a7   :  { %v1855_v33 = vpop.f32.mrb[10].mxu0  ;;  %v607_v15 = vsub.f32 %v601_v18, %v2570_v61  ;;  %v2225_v61 = vunpack.i.h.bf16 %v2223_v38 }
 0x4a8   :  { %v590_v35 = vpop.f32.mrb[11].mxu0  ;;  %v604_v19 = vmul.f32 2.0, %v1855_v33 }
 0x4a9   :  { %v603_v36 = vmul.f32 2.0, %v590_v35  ;;  %2247 = vrot.lane.b32.xlu1 %v2246_v34, %s2324_s28  ;;  %v732_v43 = vsel %vm731_vm1, %v2403_v0, %v2225_v61  ;;  %v2234_v0 = vunpack.i.l.bf16 %v2233_v45  ;;  %v990_v34 = vld [vmem:[#allocation2 + $0x160] sm:$0xff]  ;;  %v991_v35 = vld [vmem:[#allocation2 + $0x168] sm:$0xff] }
 0x4aa   :  { %v610_v22 = vsub.f32 %v604_v19, %v2575_v9  ;;  %v2107_v18 = vpack.c.bf16 %v991_v35, %v990_v34 }
 0x4ab   :  { %v609_v41 = vsub.f32 %v603_v36, %v2578_v16  ;;  %v606_v16 = vsub.f32 %v600_v31, %v2559_v53  ;;  %v2228_v53 = vpop.permute.xlu0 %2227  ;;  %v2125_v36 = vpack.c.bf16 %v1081_v27, %v1080_v6 }
 0x4ac   :  { %v2229_v55 = vunpack.i.l.bf16 %v2228_v53 }
 0x4ad   :  { %2257 = vrot.lane.b32.xlu1 %v2256_v47, %s2326_s9  ;;  %721 = vrot.lane.b32.xlu0 %v609_v41, %s2328_s10  ;;  %v2240_v47 = vunpack.i.h.bf16 %v2238_v28  ;;  %v1085_v28 = vld [vmem:[#allocation4 + $0xb8] sm:$0xff] }
 0x4ae   :  { %v742_v14 = vsel %vm69_vm0, %v736_v13, %v2229_v55 }
 0x4af   :  { %v749_v63 = vsel %vm744_vm2, %v742_v14, %v2234_v0 }
 0x4b0   :  { %v756_v17 = vsel %vm751_vm3, %v749_v63, %v2239_v11  ;;  %v2116_v63 = vpack.c.bf16 %v997_v59, %v996_v12 }
 0x4b1   :  { %2262 = vrot.lane.b32.xlu1 %v2261_v23, %s2323_s0  ;;  %2242 = vrot.lane.b32.xlu0 %v2241_v20, %s2323_s0  ;;  %v602_v20 = vmul.f32 2.0, %v1852_v29  ;;  %v2104_v29 = vpack.c.bf16 %v989_v25, %v988_v24 }
 0x4b3   :  { %v608_v23 = vsub.f32 %v602_v20, %v2567_v60 }
 0x4b5   :  { %2267 = vrot.lane.b32.xlu1 %v2266_v39, %s2324_s28  ;;  %2252 = vrot.lane.b32.xlu0 %v2251_v54, %s2325_s30  ;;  %v1082_v39 = vld [vmem:[#allocation4 + $0xa0] sm:$0xff]  ;;  %v1083_v54 = vld [vmem:[#allocation4 + $0xa8] sm:$0xff] }
 0x4b6   :  { %v2128_v38 = vpack.c.bf16 %v1083_v54, %v1082_v39  ;;  %v1088_v39 = vld [vmem:[#allocation4 + $0xd0] sm:$0xff]  ;;  %v1089_v54 = vld [vmem:[#allocation4 + $0xd8] sm:$0xff] }
 0x4b9   :  { %695 = vrot.lane.b32.xlu1 %v2601_v37, %s2326_s9  ;;  %715 = vrot.lane.b32.xlu0 %v606_v16, %s2328_s10  ;;  %v2230_v37 = vunpack.i.h.bf16 %v2228_v53 }
 0x4bd   :  { %675 = vrot.lane.b32.xlu1 %v2575_v9, %s2325_s30  ;;  %717 = vrot.lane.b32.xlu0 %v607_v15, %s2328_s10  ;;  %v982_v9 = vld [vmem:[#allocation2 + $0x120] sm:$0xff] }
 0x4be   :  { %v2095_v44 = vpack.c.bf16 %v983_v42, %v982_v9 }
 0x4c1   :  { %723 = vrot.lane.b32.xlu1 %v610_v22, %s2328_s10  ;;  %671 = vrot.lane.b32.xlu0 %v2567_v60, %s2325_s30  ;;  %v738_v60 = vsel %vm69_vm0, %v732_v43, %v2230_v37  ;;  %v992_v22 = vld [vmem:[#allocation2 + $0x170] sm:$0xff] }
 0x4c5   :  { %719 = vrot.lane.b32.xlu0 %v608_v23, %s2328_s10  ;;  %v993_v23 = vld [vmem:[#allocation2 + $0x178] sm:$0xff] }
 0x4c6   :  { %v2110_v42 = vpack.c.bf16 %v993_v23, %v992_v22  ;;  %v1164_v23 = vld [vmem:[#allocation4 + $0x100] sm:$0xff] }
 0x4c9   :  { %699 = vrot.lane.b32.xlu0 %v2611_v48, %s2326_s9  ;;  %v745_v48 = vsel %vm744_vm2, %v738_v60, %v2235_v40 }
 0x4ca   :  { %v752_v32 = vsel %vm751_vm3, %v745_v48, %v2240_v47  ;;  %v994_v48 = vld [vmem:[#allocation2 + $0x180] sm:$0xff] }
 0x517   :  { %v714_v49 = vpop.permute.xlu1 %713 }
 0x518   :  { %v759_v52 = vsel %vm758_vm4, %v752_v32, %v714_v49  ;;  %1610 = vmatprep.mubr.msk.f32.mxu1 %vm788_vm5, %v714_v49 }
 0x519   :  { %862 = vmatmul.mubr.f32.vlgmr.msra.gmra.mrb[18].mxu1 %v759_v52 }
 0x51a   :  { %2096 = vmatpush1.bf16.msra.mxu1 %v2095_v44  ;;  %v995_v44 = vld [vmem:[#allocation2 + $0x188] sm:$0xff] }
 0x51b   :  { %v2688_v58 = vpop.permute.xlu1 %2247  ;;  %2097 = vmatprep.subr.bf16.mxu1 %v2327_v56 }
 0x51c   :  { %v2249_v15 = vunpack.i.l.bf16 %v2688_v58  ;;  %v2250_v37 = vunpack.i.h.bf16 %v2688_v58 }
 0x51e   :  { %2099 = vmatpush1.bf16.msra.mxu1 %v2098_v57  ;;  %v2113_v57 = vpack.c.bf16 %v995_v44, %v994_v48  ;;  %v1174_v44 = vld [vmem:[#allocation4 + $0x150] sm:$0xff] }
 0x51f   :  { %v2695_v8 = vpop.permute.xlu1 %2257  ;;  %v722_v21 = vpop.permute.xlu0 %721  ;;  %2100 = vmatprep.subr.bf16.mxu1 %v2327_v56 }
 0x520   :  { %v763_v26 = vsel %vm758_vm4, %v756_v17, %v722_v21  ;;  %1615 = vmatprep.mubr.msk.f32.mxu0 %vm788_vm5, %v722_v21  ;;  %v2259_v40 = vunpack.i.l.bf16 %v2695_v8  ;;  %v2260_v52 = vunpack.i.h.bf16 %v2695_v8  ;;  %v998_v17 = vld [vmem:[#allocation2 + $0x1a0] sm:$0xff]  ;;  %v999_v21 = vld [vmem:[#allocation2 + $0x1a8] sm:$0xff] }
 0x521   :  { %976 = vmatmul.mubr.f32.vlgmr.msra.gmra.mrb[12].mxu0 %v763_v26 }
 0x522   :  { %2102 = vmatpush1.bf16.msra.mxu1 %v2101_v3  ;;  %2123 = vmatpush3.bf16.msra.mxu0 %v2122_v5 }
 0x523   :  { %v2701_v30 = vpop.permute.xlu1 %2262  ;;  %v2243_v33 = vpop.permute.xlu0 %2242  ;;  %2103 = vmatprep.subr.bf16.mxu1 %v2327_v56  ;;  %2124 = vmatprep.subr.bf16.mxu0 %v2327_v56 }
 0x524   :  { %v2245_v41 = vunpack.i.h.bf16 %v2243_v33  ;;  %v2244_v31 = vunpack.i.l.bf16 %v2243_v33  ;;  %v2264_v0 = vunpack.i.l.bf16 %v2701_v30  ;;  %v2265_v25 = vunpack.i.h.bf16 %v2701_v30 }
 0x526   :  { %v733_v16 = vsel %vm731_vm1, %v2408_v1, %v2244_v31  ;;  %2105 = vmatpush1.bf16.msra.mxu1 %v2104_v29  ;;  %2126 = vmatpush3.bf16.msra.mxu0 %v2125_v36  ;;  %v734_v45 = vsel %vm731_vm1, %v2413_v2, %v2245_v41  ;;  %v1084_v1 = vld [vmem:[#allocation4 + $0xb0] sm:$0xff]  ;;  %v735_v14 = vsel %vm731_vm1, %v2420_v4, %v2264_v0 }
 0x527   :  { %v2708_v19 = vpop.permute.xlu1 %2267  ;;  %v2253_v20 = vpop.permute.xlu0 %2252  ;;  %2106 = vmatprep.subr.bf16.mxu1 %v2327_v56  ;;  %2127 = vmatprep.subr.bf16.mxu0 %v2327_v56  ;;  %v739_v47 = vsel %vm69_vm0, %v733_v16, %v2249_v15  ;;  %v740_v2 = vsel %vm69_vm0, %v734_v45, %v2250_v37  ;;  %v2131_v32 = vpack.c.bf16 %v1085_v28, %v1084_v1  ;;  %v1090_v16 = vld [vmem:[#allocation4 + $0xe0] sm:$0xff]  ;;  %v1167_v1 = vld [vmem:[#allocation4 + $0x118] sm:$0xff] }
 0x528   :  { %v2255_v53 = vunpack.i.h.bf16 %v2253_v20  ;;  %v2254_v61 = vunpack.i.l.bf16 %v2253_v20  ;;  %v2269_v10 = vunpack.i.l.bf16 %v2708_v19  ;;  %v2270_v26 = vunpack.i.h.bf16 %v2708_v19  ;;  %v1092_v19 = vld [vmem:[#allocation4 + $0xf0] sm:$0xff]  ;;  %v1093_v20 = vld [vmem:[#allocation4 + $0xf8] sm:$0xff]  ;;  %v1168_v37 = vld [vmem:[#allocation4 + $0x120] sm:$0xff] }
 0x529   :  { %v2119_v4 = vpack.c.bf16 %v999_v21, %v998_v17  ;;  %v737_v33 = vsel %vm731_vm1, %v2432_v7, %v2265_v25  ;;  %v2137_v7 = vpack.c.bf16 %v1089_v54, %v1088_v39  ;;  %v2143_v22 = vpack.c.bf16 %v1093_v20, %v1092_v19  ;;  %v1254_v54 = vld [vmem:[#allocation4 + $0x20] sm:$0xff]  ;;  %v1256_v19 = vld [vmem:[#allocation4 + $0x30] sm:$0xff]  ;;  %v1257_v20 = vld [vmem:[#allocation4 + $0x38] sm:$0xff] }
 0x52a   :  { %2108 = vmatpush1.bf16.msra.mxu1 %v2107_v18  ;;  %v746_v9 = vsel %vm744_vm2, %v739_v47, %v2254_v61  ;;  %2129 = vmatpush3.bf16.msra.mxu0 %v2128_v38  ;;  %v747_v50 = vsel %vm744_vm2, %v740_v2, %v2255_v53  ;;  %v741_v5 = vsel %vm69_vm0, %v735_v14, %v2269_v10  ;;  %v1091_v18 = vld [vmem:[#allocation4 + $0xe8] sm:$0xff]  ;;  %v2330_v53 = vmov 0.0   ;;  %v1166_v61 = vld [vmem:[#allocation4 + $0x110] sm:$0xff] }
 0x52b   :  { %v716_v43 = vpop.permute.xlu0 %715  ;;  %v753_v60 = vsel %vm751_vm3, %v746_v9, %v2259_v40  ;;  %2109 = vmatprep.subr.bf16.mxu1 %v2327_v56  ;;  %2130 = vmatprep.subr.bf16.mxu0 %v2327_v56  ;;  %v696_v55 = vpop.permute.xlu1 %695  ;;  %v754_v58 = vsel %vm751_vm3, %v747_v50, %v2260_v52  ;;  %v743_v30 = vsel %vm69_vm0, %v737_v33, %v2270_v26  ;;  %v1165_v38 = vld [vmem:[#allocation4 + $0x108] sm:$0xff]  ;;  %v1170_v9 = vld [vmem:[#allocation4 + $0x130] sm:$0xff]  ;;  %v1176_v50 = vld [vmem:[#allocation4 + $0x160] sm:$0xff] }
 0x52c   :  { %1611 = vmatprep.mubr.msk.f32.mxu1 %vm788_vm5, %v716_v43  ;;  %v760_v49 = vsel %vm758_vm4, %v753_v60, %v716_v43  ;;  %v2140_v15 = vpack.c.bf16 %v1091_v18, %v1090_v16  ;;  %v2146_v45 = vpack.c.bf16 %v1165_v38, %v1164_v23  ;;  %1888 = vmatprep.mubr.msk.f32.mxu0 %vm2329_vm6, %v2330_v53  ;;  %v1169_v40 = vld [vmem:[#allocation4 + $0x128] sm:$0xff]  ;;  %v1172_v60 = vld [vmem:[#allocation4 + $0x140] sm:$0xff]  ;;  %v1178_v52 = vld [vmem:[#allocation4 + $0x170] sm:$0xff] }
 0x52d   :  { %867 = vmatmul.mubr.f32.gmra.mrb[20].mxu1 %v760_v49  ;;  %v2149_v28 = vpack.c.bf16 %v1167_v1, %v1166_v61  ;;  %v2152_v47 = vpack.c.bf16 %v1169_v40, %v1168_v37  ;;  %v1173_v2 = vld [vmem:[#allocation4 + $0x148] sm:$0xff]  ;;  %v2164_v46 = vpack.c.bf16 %v1177_v51, %v1176_v50  ;;  %v1266_v26 = vld [vmem:[%s2829_s2] sm:$0xff]  ;;  %v1258_v23 = vld [vmem:[#allocation4 + $0x40] sm:$0xff] }
 0x52e   :  { %2111 = vmatpush1.bf16.msra.mxu1 %v2110_v42  ;;  %2132 = vmatpush3.bf16.msra.mxu0 %v2131_v32  ;;  %v1171_v42 = vld [vmem:[#allocation4 + $0x138] sm:$0xff]  ;;  %v2158_v48 = vpack.c.bf16 %v1173_v2, %v1172_v60  ;;  %v1609_v33 = vld [vmem:[%s2832_s5] ss:$0 sm:$0xff]  ;;  %v1269_v16 = vld [vmem:[%s2829_s2 + $0x18] sm:$0xff] }
 0x52f   :  { %v718_v11 = vpop.permute.xlu0 %717  ;;  %2112 = vmatprep.subr.bf16.mxu1 %v2327_v56  ;;  %2133 = vmatprep.subr.bf16.mxu0 %v2327_v56  ;;  %v676_v3 = vpop.permute.xlu1 %675  ;;  %v2155_v43 = vpack.c.bf16 %v1171_v42, %v1170_v9  ;;  %v1175_v32 = vld [vmem:[#allocation4 + $0x158] sm:$0xff]  ;;  %v1259_v38 = vld [vmem:[#allocation4 + $0x48] sm:$0xff]  ;;  %v1453_v51 = vld [vmem:[%s2830_s3] sm:$0xff] }
 0x530   :  { %1612 = vmatprep.mubr.msk.f32.mxu1 %vm788_vm5, %v718_v11  ;;  %v761_v13 = vsel %vm758_vm4, %v754_v58, %v718_v11  ;;  %v750_v35 = vsel %vm744_vm2, %v743_v30, %v676_v3  ;;  %v2161_v49 = vpack.c.bf16 %v1175_v32, %v1174_v44  ;;  %v1614_v11 = vld [vmem:[%s2832_s5 + $0x1] ss:$0 sm:$0xff]  ;;  %v1261_v61 = vld [vmem:[#allocation4 + $0x58] sm:$0xff]  ;;  %v1263_v37 = vld [vmem:[#allocation4 + $0x68] sm:$0xff] }
 0x531   :  { %872 = vmatmul.mubr.f32.gmra.mrb[22].mxu1 %v761_v13  ;;  %v1265_v9 = vld [vmem:[#allocation4 + $0x78] sm:$0xff] }
 0x532   :  { %2114 = vmatpush1.bf16.msra.mxu1 %v2113_v57  ;;  %2135 = vmatpush3.bf16.msra.mxu0 %v2134_v62 }
 0x533   :  { %v672_v8 = vpop.permute.xlu0 %671  ;;  %2115 = vmatprep.subr.bf16.mxu1 %v2327_v56  ;;  %2136 = vmatprep.subr.bf16.mxu0 %v2327_v56  ;;  %v724_v34 = vpop.permute.xlu1 %723 }
 0x534   :  { %v748_v24 = vsel %vm744_vm2, %v741_v5, %v672_v8  ;;  %v1616_v8 = vld [vmem:[%s2832_s5 + $0x2] ss:$0 sm:$0xff] }
 0x535   :  { %v755_v27 = vsel %vm751_vm3, %v748_v24, %v696_v55  ;;  %v1179_v55 = vld [vmem:[#allocation4 + $0x178] sm:$0xff] }
 0x536   :  { %2117 = vmatpush1.bf16.msra.mxu1 %v2116_v63  ;;  %2138 = vmatpush3.bf16.msra.mxu0 %v2137_v7  ;;  %v2167_v0 = vpack.c.bf16 %v1179_v55, %v1178_v52  ;;  %v1255_v7 = vld [vmem:[#allocation4 + $0x28] sm:$0xff]  ;;  %v1455_v52 = vld [vmem:[%s2830_s3 + $0x10] sm:$0xff] }
 0x537   :  { %v720_v6 = vpop.permute.xlu0 %719  ;;  %2118 = vmatprep.subr.bf16.mxu1 %v2327_v56  ;;  %2139 = vmatprep.subr.bf16.mxu0 %v2327_v56  ;;  %v2177_v18 = vpack.c.bf16 %v1255_v7, %v1254_v54  ;;  %v1456_v55 = vld [vmem:[%s2830_s3 + $0x18] sm:$0xff] }
 0x538   :  { %1613 = vmatprep.mubr.msk.f32.mxu1 %vm788_vm5, %v720_v6  ;;  %v762_v29 = vsel %vm758_vm4, %v755_v27, %v720_v6  ;;  %v1251_v6 = vld [vmem:[#allocation4 + $0x8] sm:$0xff]  ;;  %v1252_v27 = vld [vmem:[#allocation4 + $0x10] sm:$0xff] }
 0x539   :  { %877 = vmatmul.mubr.f32.gmra.mrb[24].mxu1 %v762_v29  ;;  %v1253_v29 = vld [vmem:[#allocation4 + $0x18] sm:$0xff] }
 0x53a   :  { %1617 = vmatprep.mubr.msk.f32.mxu1 %vm788_vm5, %v724_v34  ;;  %2120 = vmatpush1.bf16.msra.mxu1 %v2119_v4  ;;  %v1250_v4 = vld [vmem:[#allocation4] sm:$0xff] }
 0x53b   :  { %v700_v36 = vpop.permute.xlu0 %699  ;;  %2145 = vmatprep.subr.bf16.mxu1 %v2327_v56  ;;  %2141 = vmatpush3.bf16.msra.mxu0 %v2140_v15 }
 0x53c   :  { %v757_v41 = vsel %vm751_vm3, %v750_v35, %v700_v36  ;;  %2142 = vmatprep.subr.bf16.mxu0 %v2327_v56  ;;  %v1267_v35 = vld [vmem:[%s2829_s2 + $0x8] sm:$0xff] }
 0x53d   :  { %v764_v31 = vsel %vm758_vm4, %v757_v41, %v724_v34  ;;  %v2169_v34 = vpack.c.bf16 %v1251_v6, %v1250_v4  ;;  %v1268_v41 = vld [vmem:[%s2829_s2 + $0x10] sm:$0xff] }
 0x53e   :  { %1072 = vmatmul.mubr.f32.vlgmr.msra.gmra.mrb[26].mxu1 %v764_v31  ;;  %v2173_v31 = vpack.c.bf16 %v1253_v29, %v1252_v27 }
 0x53f   :  { %2144 = vmatpush3.bf16.msra.mxu0 %v2143_v22  ;;  %2147 = vmatpush3.bf16.msra.mxu1 %v2146_v45  ;;  %v2181_v22 = vpack.c.bf16 %v1257_v20, %v1256_v19  ;;  %v2185_v45 = vpack.c.bf16 %v1259_v38, %v1258_v23 }
 0x540   :  { %2148 = vmatprep.subr.bf16.mxu1 %v2327_v56  ;;  %1923 = vmatprep.mubr.msk.f32.mxu1 %vm2329_vm6, %v2330_v53  ;;  %v1260_v53 = vld [vmem:[#allocation4 + $0x50] sm:$0xff] }
 0x541   :  { %v2189_v1 = vpack.c.bf16 %v1261_v61, %v1260_v53 }
 0x543   :  { %2150 = vmatpush3.bf16.msra.mxu1 %v2149_v28  ;;  %v1262_v28 = vld [vmem:[#allocation4 + $0x60] sm:$0xff] }
 0x544   :  { %2151 = vmatprep.subr.bf16.mxu1 %v2327_v56  ;;  %v2193_v40 = vpack.c.bf16 %v1263_v37, %v1262_v28 }
 0x547   :  { %2153 = vmatpush3.bf16.msra.mxu1 %v2152_v47  ;;  %v1264_v47 = vld [vmem:[#allocation4 + $0x70] sm:$0xff] }
 0x548   :  { %2154 = vmatprep.subr.bf16.mxu1 %v2327_v56  ;;  %v2197_v42 = vpack.c.bf16 %v1265_v9, %v1264_v47 }
 0x54b   :  { %2156 = vmatpush3.bf16.msra.mxu1 %v2155_v43 }
 0x54c   :  { %2157 = vmatprep.subr.bf16.mxu1 %v2327_v56 }
 0x54f   :  { %2159 = vmatpush3.bf16.msra.mxu1 %v2158_v48 }
 0x550   :  { %2160 = vmatprep.subr.bf16.mxu1 %v2327_v56 }
 0x553   :  { %2162 = vmatpush3.bf16.msra.mxu1 %v2161_v49 }
 0x554   :  { %2163 = vmatprep.subr.bf16.mxu1 %v2327_v56 }
 0x557   :  { %2165 = vmatpush3.bf16.msra.mxu1 %v2164_v46  ;;  %v1454_v46 = vld [vmem:[%s2830_s3 + $0x8] sm:$0xff] }
 0x558   :  { %2166 = vmatprep.subr.bf16.mxu1 %v2327_v56 }
 0x55b   :  { %2168 = vmatpush3.bf16.msra.mxu1 %v2167_v0  ;;  %v1626_v0 = vld [vmem:[%s2834_s7] ss:$0 sm:$0xff] }
 0x5ec   :  { %v863_v57 = vpop.f32.mrb[18].mxu1 }
 0x5ed   :  { %v865_v10 = vpop.f32.mrb[19].mxu1  ;;  %v864_v39 = vadd.f32 %v1609_v33, %v863_v57 }
 0x5ef   :  { %v882_v15 = vmax.f32 %v864_v39, 0.0 }
 0x5f4   :  { %v977_v58 = vpop.f32.mrb[12].mxu0 }
 0x5f5   :  { %v978_v12 = vadd.f32 %v1614_v11, %v977_v58  ;;  %v979_v59 = vpop.f32.mrb[13].mxu0 }
 0x5f7   :  { %v981_v62 = vmax.f32 %v978_v12, 0.0 }
 0x5f9   :  { %1889 = vmatmul.mubr.f32.vlgmr.msra.gmra.mrb[14].mxu0 %v981_v62 }
 0x5fa   :  { %1928 = vmatprep.mubr.msk.f32.mxu0 %vm1270_vm7, %v1266_v26 }
 0x600   :  { %v2765_v13 = vpop.f32.mrb[20].mxu1 }
 0x601   :  { %v870_v14 = vpop.f32.mrb[21].mxu1  ;;  %v869_v43 = vadd.f32 %v1609_v33, %v2765_v13 }
 0x603   :  { %v883_v44 = vmax.f32 %v869_v43, 0.0 }
 0x604   :  { %v2767_v63 = vpop.f32.mrb[22].mxu1 }
 0x605   :  { %v875_v56 = vpop.f32.mrb[23].mxu1  ;;  %v874_v2 = vadd.f32 %v1609_v33, %v2767_v63 }
 0x607   :  { %v884_v49 = vmax.f32 %v874_v2, 0.0 }
 0x60c   :  { %v2769_v3 = vpop.f32.mrb[24].mxu1 }
 0x60d   :  { %v880_v5 = vpop.f32.mrb[25].mxu1  ;;  %v879_v32 = vadd.f32 %v1609_v33, %v2769_v3 }
 0x60f   :  { %v885_v50 = vmax.f32 %v879_v32, 0.0 }
 0x611   :  { %v1073_v17 = vpop.f32.mrb[26].mxu1 }
 0x612   :  { %v1074_v21 = vadd.f32 %v1616_v8, %v1073_v17  ;;  %v1075_v24 = vpop.f32.mrb[27].mxu1 }
 0x614   :  { %v1077_v25 = vmax.f32 %v1074_v21, 0.0 }
 0x616   :  { %1924 = vmatmul.mubr.f32.vlgmr.msra.gmra.mrb[28].mxu1 %v1077_v25 }
 0x6cc   :  { %v1160_v30 = vpop.f32.mrb[14].mxu0 }
 0x6cd   :  { %v1890_v36 = vpop.f32.mrb[15].mxu0  ;;  %1926 = vmatprep.subr.mxu0 %v1160_v30 }
 0x6ce   :  { %1927 = vmatpush3.msra.mxu0 %v1160_v30 }
 0x6cf   :  { %1929 = vmatmul.mubr.msk.f32.vlgmr.msra.gmra.mrb[16].mxu0 %vm1270_vm7, %v1267_v35  ;;  %2170 = vmatprep.subr.bf16.mxu0 %v2169_v34 }
 0x6d0   :  { %2172 = vmatpush3.bf16.msra.mxu0 %v2169_v34  ;;  %1931 = vmatprep.mubr.msk.f32.mxu0 %vm1270_vm7, %v1268_v41 }
 0x6d1   :  { %2174 = vmatprep.subr.bf16.mxu0 %v2173_v31 }
 0x6d3   :  { %1932 = vmatmul.mubr.msk.f32.gmra.mrb[18].mxu0 %vm1270_vm7, %v1269_v16 }
 0x6d4   :  { %2176 = vmatpush3.bf16.msra.mxu0 %v2173_v31  ;;  %1966 = vmatprep.mubr.f32.mxu0 %v882_v15 }
 0x6d5   :  { %2178 = vmatprep.subr.bf16.mxu0 %v2177_v18 }
 0x6d8   :  { %2180 = vmatpush3.bf16.msra.mxu0 %v2177_v18 }
 0x6d9   :  { %2182 = vmatprep.subr.bf16.mxu0 %v2181_v22 }
 0x6dc   :  { %2184 = vmatpush3.bf16.msra.mxu0 %v2181_v22 }
 0x6dd   :  { %2186 = vmatprep.subr.bf16.mxu0 %v2185_v45 }
 0x6e0   :  { %2188 = vmatpush3.bf16.msra.mxu0 %v2185_v45 }
 0x6e1   :  { %2190 = vmatprep.subr.bf16.mxu0 %v2189_v1 }
 0x6e4   :  { %2192 = vmatpush3.bf16.msra.mxu0 %v2189_v1 }
 0x6e5   :  { %2194 = vmatprep.subr.bf16.mxu0 %v2193_v40 }
 0x6e8   :  { %2196 = vmatpush3.bf16.msra.mxu0 %v2193_v40 }
 0x6e9   :  { %v1246_v60 = vpop.f32.mrb[28].mxu1  ;;  %2198 = vmatprep.subr.bf16.mxu0 %v2197_v42 }
 0x6ea   :  { %v1925_v48 = vpop.f32.mrb[29].mxu1 }
 0x6ec   :  { %2200 = vmatpush3.bf16.msra.mxu0 %v2197_v42 }
 0x6ed   :  { %1972 = vmatprep.subr.mxu0 %v1246_v60 }
 0x6ef   :  { %1967 = vmatmul.mubr.f32.vlgmr.msra.gmra.mrb[16].mxu0 %v883_v44 }
 0x6f0   :  { %1969 = vmatprep.mubr.f32.mxu0 %v884_v49  ;;  %1973 = vmatpush3.msra.mxu0 %v1246_v60 }
 0x6f3   :  { %1970 = vmatmul.mubr.f32.gmra.mrb[18].mxu0 %v885_v50 }
 0x6f4   :  { %1974 = vmatprep.mubr.msk.f32.mxu0 %vm1270_vm7, %v1453_v51 }
 0x6f7   :  { %1975 = vmatmul.mubr.msk.f32.vlgmr.msra.gmra.mrb[16].mxu0 %vm1270_vm7, %v1454_v46 }
 0x6f8   :  { %1977 = vmatprep.mubr.msk.f32.mxu0 %vm1270_vm7, %v1455_v52 }
 0x6fb   :  { %1978 = vmatmul.mubr.msk.f32.gmra.mrb[18].mxu0 %vm1270_vm7, %v1456_v55 }
 0x7ca   :  { %v1976_v57 = vpop.f32.mrb[16].mxu0 }
 0x7cb   :  { %v1566_v10 = vadd.f32 %v1976_v57, %v1626_v0  ;;  %v1535_v11 = vpop.f32.mrb[17].mxu0 }
 0x7cc   :  { %v1565_v58 = vadd.f32 %v1626_v0, %v1535_v11 }
 0x7cd   :  { %1570 = vst [vmem:[%s2835_s8 + $0x8] sm:$0xff] %v1566_v10 }
 0x7ce   :  { %1569 = vst [vmem:[%s2835_s8] sm:$0xff] %v1565_v58  ;;  %v1979_v12 = vpop.f32.mrb[18].mxu0 }
 0x7cf   :  { %v1568_v59 = vadd.f32 %v1979_v12, %v1626_v0  ;;  %v1545_v62 = vpop.f32.mrb[19].mxu0 }
 0x7d0   :  { %v1567_v13 = vadd.f32 %v1626_v0, %v1545_v62 }
 0x7d1   :  { %1572 = vst [vmem:[%s2835_s8 + $0x18] sm:$0xff] %v1568_v59 }
 0x7d2   :  { %1571 = vst [vmem:[%s2835_s8 + $0x10] sm:$0xff] %v1567_v13 }
 0x7d3   :  { %1577 = vsyncpa [#allocation3], 1 }
 0x7d4   :  { %1578 = vsyncpa [#allocation5], 1 }

</bundles_post_ra>
